<compile_context>
chip_gen: v5e
topology: v5e:2x2
jax: 0.10.0
libtpu: 0.0.40
codegen_flags: <defaults>
</compile_context>

<pallas_src>
import functools

import jax
import jax.numpy as jnp
from jax.experimental import pallas as pl
from jax.experimental.pallas import tpu as pltpu

LANE = 128          # TPU lane width (last dim of a vreg)
SUBLANE = 8         # TPU sublane count (second-to-last dim of a vreg)
BATCH_TILE = 2048   # rows per grid step once the batch no longer fits one step


def _round_up(n: int, m: int) -> int:
    return ((n + m - 1) // m) * m


def _qnet_kernel(x_ref, w1_ref, w2_ref, b_ref, out_ref):
    """One batch tile of: relu(x @ W1 + b1) @ W2 + b2."""
    hid_p = w1_ref.shape[1]          # hidden padded to a multiple of 128 lanes
    out_dim = out_ref.shape[-1]      # true output width (e.g. 3)

    # Hidden layer: narrow-K matmul (K = in_features) straight on the MXU.
    h = jnp.dot(x_ref[...], w1_ref[...], preferred_element_type=jnp.float32)
    h = jnp.maximum(h + b_ref[0:1, :hid_p], 0.0)         # (Bt,Hp) + (1,Hp)

    # Output layer; padded hidden lanes are exactly zero (zero W2 rows).
    y = jnp.dot(h, w2_ref[...], preferred_element_type=jnp.float32)
    out_ref[...] = (y + b_ref[1:2, :out_dim]).astype(out_ref.dtype)


def prepare_qnet_params(w1, b1, w2, b2, dtype=jnp.float32):
    """One-time parameter preparation (call once at init, NOT per forward).

    torch.nn.Linear stores W as (out, in); we transpose to (in, out).  Only
    the hidden dimension is zero-padded to a multiple of 128 lanes (so the
    intermediate activations are lane-dense); the input and output feature
    dims are left at their true sizes — their blocks cover the full array
    dims, which is legal and avoids any wrapper-side pad/slice.

    Returns (w1_p, w2_p, b_packed).
    """
    hidden, in_dim = w1.shape
    out_dim = int(w2.shape[0])

    hid_p = _round_up(hidden, LANE)
    b_lanes = max(hid_p, _round_up(out_dim, LANE))

    w1_p = (jnp.zeros((in_dim, hid_p), dtype)
            .at[:, :hidden].set(jnp.asarray(w1, dtype).T))
    w2_p = (jnp.zeros((hid_p, out_dim), dtype)
            .at[:hidden, :].set(jnp.asarray(w2, dtype).T))
    # Pack both biases into one operand: row 0 = b1 (padded), row 1 = b2.
    b_packed = (jnp.zeros((SUBLANE, b_lanes), jnp.float32)
                .at[0, :hidden].set(jnp.asarray(b1, jnp.float32))
                .at[1, :out_dim].set(jnp.asarray(b2, jnp.float32)))
    return w1_p, w2_p, b_packed


@jax.jit
def linear_qnet_forward(x, w1_p, w2_p, b_packed):
    """x: (B, in_features). Params come from prepare_qnet_params."""
    B, in_dim = x.shape
    hid_p = w1_p.shape[1]
    out_dim = w2_p.shape[1]
    b_lanes = b_packed.shape[1]

    if B <= BATCH_TILE:
        # One fat grid step: no batch padding, no output slicing, minimum
        # fixed overhead.  Block shapes equal full array dims -> always legal.
        b_tile = B
        n_steps = 1
        semantics = ("arbitrary",)
    else:
        # Large RL replay batches: tile at 2048 rows and shard across
        # TensorCores (enough work per core to amortize weight DMA).
        # Padded boundary rows only affect boundary output rows, whose stores
        # are clipped to (B, out_dim) by Pallas, so correctness is preserved.
        b_tile = BATCH_TILE
        n_steps = pl.cdiv(B, b_tile)
        semantics = ("parallel",)

    itemsize = jnp.dtype(jnp.float32).itemsize
    flops = 2 * B * (in_dim * hid_p + hid_p * out_dim)
    bytes_accessed = itemsize * (B * in_dim + in_dim * hid_p + hid_p * out_dim
                                 + SUBLANE * b_lanes + B * out_dim)

    return pl.pallas_call(
        _qnet_kernel,
        out_shape=jax.ShapeDtypeStruct((B, out_dim), jnp.float32),
        grid_spec=pltpu.PrefetchScalarGridSpec(
            num_scalar_prefetch=0,
            grid=(n_steps,),
            in_specs=[
                pl.BlockSpec((b_tile, in_dim), lambda i: (i, 0)),   # x tile (unpadded)
                pl.BlockSpec((in_dim, hid_p), lambda i: (0, 0)),    # W1 resident
                pl.BlockSpec((hid_p, out_dim), lambda i: (0, 0)),   # W2 resident
                pl.BlockSpec((SUBLANE, b_lanes), lambda i: (0, 0)),  # packed biases
            ],
            out_specs=pl.BlockSpec((b_tile, out_dim), lambda i: (i, 0)),
        ),
        compiler_params=pltpu.CompilerParams(
            dimension_semantics=semantics),
        cost_estimate=pl.CostEstimate(
            flops=flops, transcendentals=0, bytes_accessed=bytes_accessed),
    )(x, w1_p, w2_p, b_packed)


def _reference_forward(x, w1, b1, w2, b2):
    # HIGHEST precision so the XLA reference matmuls accumulate in (near) f32,
    # matching the in-kernel f32 MXU accumulation.
    hp = jax.lax.Precision.HIGHEST
    h = jnp.maximum(jnp.dot(x, w1.T, precision=hp) + b1, 0.0)
    return jnp.dot(h, w2.T, precision=hp) + b2


# TODO(synk): Linear_QNet.save() (torch.save of the state_dict) is host-side
# checkpoint I/O with no Pallas equivalent; only forward() is implemented.

if __name__ == "__main__":
    # Snake Q-net shapes: 11 state features, hidden=32, 3 actions. Batch=256.
    batch, input_size, hidden_size, output_size = 256, 11, 32, 3

    key = jax.random.PRNGKey(0)
    kx, k1, k2, k3, k4 = jax.random.split(key, 5)

    x = jax.random.normal(kx, (batch, input_size), dtype=jnp.float32)

    # Deterministic init mimicking nn.Linear's uniform(-1/sqrt(in), 1/sqrt(in)).
    bound1 = 1.0 / (input_size ** 0.5)
    bound2 = 1.0 / (hidden_size ** 0.5)
    w1 = jax.random.uniform(k1, (hidden_size, input_size), jnp.float32, -bound1, bound1)
    b1 = jax.random.uniform(k2, (hidden_size,), jnp.float32, -bound1, bound1)
    w2 = jax.random.uniform(k3, (output_size, hidden_size), jnp.float32, -bound2, bound2)
    b2 = jax.random.uniform(k4, (output_size,), jnp.float32, -bound2, bound2)

    # One-time parameter prep (transpose + hidden-lane padding + bias packing).
    w1_p, w2_p, b_packed = prepare_qnet_params(w1, b1, w2, b2)

    out = linear_qnet_forward(x, w1_p, w2_p, b_packed)
    out = jax.block_until_ready(out)

    ref = _reference_forward(x, w1, b1, w2, b2)
    assert out.shape == (batch, output_size)
    assert jnp.allclose(out, ref, atol=1e-4, rtol=1e-4), "mismatch vs reference"

    print("KERNEL_OK")
</pallas_src>

<mosaic_0001>
module attributes {stable_mosaic.version = 11 : i64} {
  func.func @_qnet_kernel(%arg0: i32, %arg1: memref<256x11xf32, #tpu.memory_space<vmem>>, %arg2: memref<11x128xf32, #tpu.memory_space<vmem>>, %arg3: memref<128x3xf32, #tpu.memory_space<vmem>>, %arg4: memref<8x128xf32, #tpu.memory_space<vmem>>, %arg5: memref<256x3xf32, #tpu.memory_space<vmem>>) attributes {dimension_semantics = [#tpu.dimension_semantics<arbitrary>], iteration_bounds = array<i64: 1>, scalar_prefetch = 0 : i64, scratch_operands = 0 : i64, tpu.core_type = #tpu.core_type<tc>, window_params = [{transform_indices = @transform_0, window_bounds = array<i64: 256, 11>}, {pipeline_mode = #tpu.pipeline_mode<synchronous>, transform_indices = @transform_1, window_bounds = array<i64: 11, 128>}, {pipeline_mode = #tpu.pipeline_mode<synchronous>, transform_indices = @transform_2, window_bounds = array<i64: 128, 3>}, {pipeline_mode = #tpu.pipeline_mode<synchronous>, transform_indices = @transform_3, window_bounds = array<i64: 8, 128>}, {transform_indices = @transform_4, window_bounds = array<i64: 256, 3>}]} {
    %c0 = arith.constant 0 : index
    %c0_0 = arith.constant 0 : index
    %0 = vector.load %arg1[%c0, %c0_0] : memref<256x11xf32, #tpu.memory_space<vmem>>, vector<256x11xf32>
    %c0_1 = arith.constant 0 : index
    %c0_2 = arith.constant 0 : index
    %1 = vector.load %arg2[%c0_1, %c0_2] : memref<11x128xf32, #tpu.memory_space<vmem>>, vector<11x128xf32>
    %cst = arith.constant dense<0.000000e+00> : vector<256x128xf32>
    %2 = tpu.matmul %0, %1, %cst {dimension_numbers = #tpu.dot_dimension_numbers<[1], [0], [0], [1], [0, 0, 1, 1], [], []>} : vector<256x11xf32>, vector<11x128xf32>, vector<256x128xf32> -> vector<256x128xf32>
    %c0_3 = arith.constant 0 : index
    %c0_4 = arith.constant 0 : index
    %3 = vector.load %arg4[%c0_3, %c0_4] : memref<8x128xf32, #tpu.memory_space<vmem>>, vector<1x128xf32>
    %4 = vector.broadcast %3 : vector<1x128xf32> to vector<256x128xf32>
    %5 = arith.addf %2, %4 : vector<256x128xf32>
    %cst_5 = arith.constant 0.000000e+00 : f32
    %6 = vector.broadcast %cst_5 : f32 to vector<256x128xf32>
    %7 = arith.maximumf %5, %6 : vector<256x128xf32>
    %c0_6 = arith.constant 0 : index
    %c0_7 = arith.constant 0 : index
    %8 = vector.load %arg3[%c0_6, %c0_7] : memref<128x3xf32, #tpu.memory_space<vmem>>, vector<128x3xf32>
    %cst_8 = arith.constant dense<0.000000e+00> : vector<256x3xf32>
    %9 = tpu.matmul %7, %8, %cst_8 {dimension_numbers = #tpu.dot_dimension_numbers<[1], [0], [0], [1], [0, 0, 1, 1], [], []>} : vector<256x128xf32>, vector<128x3xf32>, vector<256x3xf32> -> vector<256x3xf32>
    %c1 = arith.constant 1 : index
    %c0_9 = arith.constant 0 : index
    %10 = vector.load %arg4[%c1, %c0_9] : memref<8x128xf32, #tpu.memory_space<vmem>>, vector<1x3xf32>
    %11 = vector.broadcast %10 : vector<1x3xf32> to vector<256x3xf32>
    %12 = arith.addf %9, %11 : vector<256x3xf32>
    %c0_10 = arith.constant 0 : index
    %c0_11 = arith.constant 0 : index
    %13 = vector.load %arg5[%c0_10, %c0_11] : memref<256x3xf32, #tpu.memory_space<vmem>>, vector<256x3xf32>
    tpu.vector_store %arg5[%c0_10, %c0_11], %12 {strides = array<i32>} : memref<256x3xf32, #tpu.memory_space<vmem>>, vector<256x3xf32>,
    return
  }
  func.func @transform_0(%arg0: i32) -> (i32, i32) {
    %c0_i32 = arith.constant 0 : i32
    %c0_i32_0 = arith.constant 0 : i32
    return %arg0, %c0_i32 : i32, i32
  }
  func.func @transform_1(%arg0: i32) -> (i32, i32) {
    %c0_i32 = arith.constant 0 : i32
    %c0_i32_0 = arith.constant 0 : i32
    %c0_i32_1 = arith.constant 0 : i32
    return %c0_i32, %c0_i32_0 : i32, i32
  }
  func.func @transform_2(%arg0: i32) -> (i32, i32) {
    %c0_i32 = arith.constant 0 : i32
    %c0_i32_0 = arith.constant 0 : i32
    %c0_i32_1 = arith.constant 0 : i32
    return %c0_i32, %c0_i32_0 : i32, i32
  }
  func.func @transform_3(%arg0: i32) -> (i32, i32) {
    %c0_i32 = arith.constant 0 : i32
    %c0_i32_0 = arith.constant 0 : i32
    %c0_i32_1 = arith.constant 0 : i32
    return %c0_i32, %c0_i32_0 : i32, i32
  }
  func.func @transform_4(%arg0: i32) -> (i32, i32) {
    %c0_i32 = arith.constant 0 : i32
    %c0_i32_0 = arith.constant 0 : i32
    return %arg0, %c0_i32 : i32, i32
  }
}

</mosaic_0001>

<bundles_post_ra>
// kernel: linear_qnet_forward.1
= control target key start
LH: loop header
LB: loop body
LE: loop exit
PB: predicated region body
PF: predicated region fallthrough
CT: control target
= control target key end

     0   :  { %vm150_vm0 = vcmask 1042432   ;;  %vm53_vm1 = vcmask 89088   ;;  %vm430_vm2 = vcmask 23552   ;;  %s945_s1 = inlined_call_operand.vmem [shape: f32[11,128], index: 1, kind: input, shape index: {}]   ;;  %s946_s0 = inlined_call_operand.vmem [shape: f32[256,11], index: 0, kind: input, shape index: {}]   ;;  %s947_s3 = inlined_call_operand.vmem [shape: f32[8,128], index: 3, kind: input, shape index: {}]   ;;  %s948_s2 = inlined_call_operand.vmem [shape: f32[128,3], index: 2, kind: input, shape index: {}]   ;;  %s949_s4 = inlined_call_operand.vmem [shape: f32[256,3], index: 4, kind: output, shape index: {}]  }
   0x1   :  { %v50_v0 = vld [vmem:[%s945_s1 + $0x8] sm:$0x7]  ;;  %v49_v1 = vld [vmem:[%s945_s1] sm:$0xff]  ;;  %v19_v4 = vld [vmem:[%s946_s0 + $0x10] sm:$0xff] }
   0x2   :  { %467 = vmatpush.msk.msra.mxu0 %vm150_vm0, %v50_v0  ;;  %v17_v2 = vld [vmem:[%s946_s0] sm:$0xff]  ;;  %500 = vmatpush.msk.msra.mxu3 %vm150_vm0, %v50_v0  ;;  %v18_v3 = vld [vmem:[%s946_s0 + $0x8] sm:$0xff]  ;;  %v20_v5 = vld [vmem:[%s946_s0 + $0x18] sm:$0xff] }
   0x3   :  { %v21_v6 = vld [vmem:[%s946_s0 + $0x20] sm:$0xff]  ;;  %v22_v7 = vld [vmem:[%s946_s0 + $0x28] sm:$0xff]  ;;  %v23_v8 = vld [vmem:[%s946_s0 + $0x30] sm:$0xff] }
   0x4   :  { %169 = vmatpush.msra.mxu0 %v49_v1  ;;  %501 = vmatpush.msra.mxu3 %v49_v1  ;;  %v24_v9 = vld [vmem:[%s946_s0 + $0x38] sm:$0xff]  ;;  %v25_v10 = vld [vmem:[%s946_s0 + $0x40] sm:$0xff]  ;;  %v313_v12 = vld [vmem:[%s948_s2 + $0x70] sm:$0xff] }
   0x5   :  { %468 = vmatmul.msk.f32.vlgmr.msra.gmra.mxu0 %vm53_vm1, %v17_v2  ;;  %v314_v11 = vld [vmem:[%s948_s2 + $0x78] sm:$0xff]  ;;  %v312_v13 = vld [vmem:[%s948_s2 + $0x68] sm:$0xff]  ;;  %v311_v15 = vld [vmem:[%s948_s2 + $0x60] sm:$0xff] }
   0x6   :  { %317 = vmatpush.msra.mxu1 %v314_v11  ;;  %502 = vmatpush.msra.mxu2 %v314_v11  ;;  %v26_v14 = vld [vmem:[%s946_s0 + $0x48] sm:$0xff]  ;;  %v310_v16 = vld [vmem:[%s948_s2 + $0x58] sm:$0xff]  ;;  %v309_v17 = vld [vmem:[%s948_s2 + $0x50] sm:$0xff] }
   0x7   :  { %503 = vmatpush.msrb.mxu3 %v314_v11  ;;  %v308_v18 = vld [vmem:[%s948_s2 + $0x48] sm:$0xff]  ;;  %v27_v19 = vld [vmem:[%s946_s0 + $0x50] sm:$0xff]  ;;  %v307_v20 = vld [vmem:[%s948_s2 + $0x40] sm:$0xff] }
   0x8   :  { %318 = vmatpush.msra.mxu1 %v313_v12  ;;  %504 = vmatpush.msra.mxu2 %v313_v12  ;;  %v306_v21 = vld [vmem:[%s948_s2 + $0x38] sm:$0xff]  ;;  %v305_v22 = vld [vmem:[%s948_s2 + $0x30] sm:$0xff]  ;;  %v304_v23 = vld [vmem:[%s948_s2 + $0x28] sm:$0xff] }
   0x9   :  { %505 = vmatpush.msrb.mxu3 %v313_v12  ;;  %v28_v24 = vld [vmem:[%s946_s0 + $0x58] sm:$0xff]  ;;  %v303_v25 = vld [vmem:[%s948_s2 + $0x20] sm:$0xff]  ;;  %v35_v26 = vld [vmem:[%s946_s0 + $0x90] sm:$0xff] }
   0xa   :  { %319 = vmatpush.msra.mxu1 %v312_v13  ;;  %506 = vmatpush.msra.mxu2 %v312_v13  ;;  %v302_v27 = vld [vmem:[%s948_s2 + $0x18] sm:$0xff]  ;;  %v301_v28 = vld [vmem:[%s948_s2 + $0x10] sm:$0xff]  ;;  %v29_v29 = vld [vmem:[%s946_s0 + $0x60] sm:$0xff] }
   0xb   :  { %507 = vmatpush.msrb.mxu3 %v312_v13  ;;  %v300_v30 = vld [vmem:[%s948_s2 + $0x8] sm:$0xff]  ;;  %v299_v31 = vld [vmem:[%s948_s2] sm:$0xff]  ;;  %v36_v32 = vld [vmem:[%s946_s0 + $0x98] sm:$0xff] }
   0xc   :  { %320 = vmatpush.msra.mxu1 %v311_v15  ;;  %508 = vmatpush.msra.mxu2 %v311_v15  ;;  %v30_v33 = vld [vmem:[%s946_s0 + $0x68] sm:$0xff]  ;;  %v37_v34 = vld [vmem:[%s946_s0 + $0xa0] sm:$0xff]  ;;  %v31_v35 = vld [vmem:[%s946_s0 + $0x70] sm:$0xff] }
   0xd   :  { %469 = vmatmul.msk.f32.gmra.mxu0 %vm53_vm1, %v18_v3  ;;  %509 = vmatpush.msrb.mxu3 %v311_v15  ;;  %v38_v36 = vld [vmem:[%s946_s0 + $0xa8] sm:$0xff]  ;;  %v32_v37 = vld [vmem:[%s946_s0 + $0x78] sm:$0xff]  ;;  %v39_v38 = vld [vmem:[%s946_s0 + $0xb0] sm:$0xff] }
   0xe   :  { %321 = vmatpush.msra.mxu1 %v310_v16  ;;  %510 = vmatpush.msra.mxu2 %v310_v16  ;;  %v702_v39 = vld [vmem:[%s947_s3] ss:$0 sm:$0xff]  ;;  %v40_v44 = vld [vmem:[%s946_s0 + $0xb8] sm:$0xff]  ;;  %v34_v46 = vld [vmem:[%s946_s0 + $0x88] sm:$0xff] }
   0xf   :  { %511 = vmatpush.msrb.mxu3 %v310_v16  ;;  %v33_v41 = vld [vmem:[%s946_s0 + $0x80] sm:$0xff]  ;;  %v42_v53 = vld [vmem:[%s946_s0 + $0xc8] sm:$0xff]  ;;  %v43_v57 = vld [vmem:[%s946_s0 + $0xd0] sm:$0xff] }
  0x10   :  { %322 = vmatpush.msra.mxu1 %v309_v17  ;;  %512 = vmatpush.msra.mxu2 %v309_v17  ;;  %v41_v49 = vld [vmem:[%s946_s0 + $0xc0] sm:$0xff]  ;;  %v44_v61 = vld [vmem:[%s946_s0 + $0xd8] sm:$0xff] }
  0x11   :  { %513 = vmatpush.msrb.mxu3 %v309_v17  ;;  %v45_v1 = vld [vmem:[%s946_s0 + $0xe0] sm:$0xff]  ;;  %v48_v13 = vld [vmem:[%s946_s0 + $0xf8] sm:$0xff] }
  0x12   :  { %323 = vmatpush.msra.mxu1 %v308_v18  ;;  %514 = vmatpush.msra.mxu2 %v308_v18 }
  0x13   :  { %515 = vmatpush.msrb.mxu3 %v308_v18 }
  0x14   :  { %324 = vmatpush.msra.mxu1 %v307_v20  ;;  %516 = vmatpush.msra.mxu2 %v307_v20 }
  0x15   :  { %470 = vmatmul.msk.f32.gmra.mxu0 %vm53_vm1, %v19_v4  ;;  %517 = vmatpush.msrb.mxu3 %v307_v20 }
  0x16   :  { %325 = vmatpush.msra.mxu1 %v306_v21  ;;  %518 = vmatpush.msra.mxu2 %v306_v21 }
  0x17   :  { %519 = vmatpush.msrb.mxu3 %v306_v21 }
  0x18   :  { %326 = vmatpush.msra.mxu1 %v305_v22  ;;  %520 = vmatpush.msra.mxu2 %v305_v22 }
  0x19   :  { %521 = vmatpush.msrb.mxu3 %v305_v22 }
  0x1a   :  { %327 = vmatpush.msra.mxu1 %v304_v23  ;;  %522 = vmatpush.msra.mxu2 %v304_v23 }
  0x1b   :  { %523 = vmatpush.msrb.mxu3 %v304_v23 }
  0x1c   :  { %328 = vmatpush.msra.mxu1 %v303_v25  ;;  %486 = vmatmul.msk.f32.vlgmr.msra.gmra.mxu3 %vm53_vm1, %v35_v26 }
  0x1d   :  { %471 = vmatmul.msk.f32.gmra.mxu0 %vm53_vm1, %v20_v5  ;;  %524 = vmatpush.msra.mxu2 %v303_v25  ;;  %v46_v5 = vld [vmem:[%s946_s0 + $0xe8] sm:$0xff] }
  0x1e   :  { %525 = vmatpush.msrb.mxu3 %v303_v25  ;;  %329 = vmatpush.msra.mxu1 %v302_v27 }
  0x1f   :  { %526 = vmatpush.msra.mxu2 %v302_v27 }
  0x20   :  { %527 = vmatpush.msrb.mxu3 %v302_v27  ;;  %330 = vmatpush.msra.mxu1 %v301_v28 }
  0x21   :  { %528 = vmatpush.msra.mxu2 %v301_v28 }
  0x22   :  { %529 = vmatpush.msrb.mxu3 %v301_v28  ;;  %331 = vmatpush.msra.mxu1 %v300_v30 }
  0x23   :  { %530 = vmatpush.msra.mxu2 %v300_v30 }
  0x24   :  { %332 = vmatpush.msra.mxu1 %v299_v31  ;;  %487 = vmatmul.msk.f32.gmra.mxu3 %vm53_vm1, %v36_v32 }
  0x25   :  { %472 = vmatmul.msk.f32.gmra.mxu0 %vm53_vm1, %v21_v6  ;;  %532 = vmatpush.msra.mxu2 %v299_v31 }
  0x26   :  { %531 = vmatpush.msrb.mxu3 %v300_v30 }
  0x28   :  { %533 = vmatpush.msrb.mxu3 %v299_v31 }
  0x2c   :  { %488 = vmatmul.msk.f32.gmra.mxu3 %vm53_vm1, %v37_v34 }
  0x2d   :  { %473 = vmatmul.msk.f32.gmra.mxu0 %vm53_vm1, %v22_v7 }
  0x34   :  { %489 = vmatmul.msk.f32.gmra.mxu3 %vm53_vm1, %v38_v36 }
  0x35   :  { %474 = vmatmul.msk.f32.gmra.mxu0 %vm53_vm1, %v23_v8 }
  0x3c   :  { %490 = vmatmul.msk.f32.gmra.mxu3 %vm53_vm1, %v39_v38 }
  0x3d   :  { %475 = vmatmul.msk.f32.gmra.mxu0 %vm53_vm1, %v24_v9  ;;  %v47_v9 = vld [vmem:[%s946_s0 + $0xf0] sm:$0xff] }
  0x44   :  { %491 = vmatmul.msk.f32.gmra.mxu3 %vm53_vm1, %v40_v44 }
  0x45   :  { %476 = vmatmul.msk.f32.gmra.mxu0 %vm53_vm1, %v25_v10 }
  0x4c   :  { %492 = vmatmul.msk.f32.gmra.mxu3 %vm53_vm1, %v41_v49 }
  0x4d   :  { %477 = vmatmul.msk.f32.gmra.mxu0 %vm53_vm1, %v26_v14 }
  0x54   :  { %493 = vmatmul.msk.f32.gmra.mxu3 %vm53_vm1, %v42_v53 }
  0x55   :  { %478 = vmatmul.msk.f32.gmra.mxu0 %vm53_vm1, %v27_v19 }
  0x5c   :  { %494 = vmatmul.msk.f32.gmra.mxu3 %vm53_vm1, %v43_v57 }
  0x5d   :  { %479 = vmatmul.msk.f32.gmra.mxu0 %vm53_vm1, %v28_v24 }
  0x64   :  { %495 = vmatmul.msk.f32.gmra.mxu3 %vm53_vm1, %v44_v61 }
  0x65   :  { %480 = vmatmul.msk.f32.gmra.mxu0 %vm53_vm1, %v29_v29 }
  0x6c   :  { %496 = vmatmul.msk.f32.gmra.mxu3 %vm53_vm1, %v45_v1 }
  0x6d   :  { %481 = vmatmul.msk.f32.gmra.mxu0 %vm53_vm1, %v30_v33 }
  0x74   :  { %497 = vmatmul.msk.f32.gmra.mxu3 %vm53_vm1, %v46_v5 }
  0x75   :  { %482 = vmatmul.msk.f32.gmra.mxu0 %vm53_vm1, %v31_v35 }
  0x7c   :  { %498 = vmatmul.msk.f32.gmra.mxu3 %vm53_vm1, %v47_v9 }
  0x7d   :  { %483 = vmatmul.msk.f32.gmra.mxu0 %vm53_vm1, %v32_v37 }
  0x82   :  { %v171_v40 = vpop.f32.mrf.mxu0 }
  0x83   :  { %v172_v42 = vadd.f32 %v702_v39, %v171_v40  ;;  %v767_v40 = vld [vmem:[%s947_s3 + $0x1] ss:$0 sm:$0xff] }
  0x84   :  { %499 = vmatmul.msk.f32.gmra.mxu3 %vm53_vm1, %v48_v13 }
  0x85   :  { %v267_v43 = vmax.f32 %v172_v42, 0.0  ;;  %484 = vmatmul.msk.f32.gmra.mxu0 %vm53_vm1, %v33_v41 }
  0x87   :  { %333 = vmatmul.f32.vlgmr.msra.gmra.mxu1 %v267_v43 }
  0x8a   :  { %v174_v45 = vpop.f32.mrf.mxu0 }
  0x8b   :  { %v175_v47 = vadd.f32 %v702_v39, %v174_v45 }
  0x8d   :  { %v268_v48 = vmax.f32 %v175_v47, 0.0  ;;  %485 = vmatmul.msk.f32.gmra.mxu0 %vm53_vm1, %v34_v46 }
  0x8f   :  { %336 = vmatmul.f32.gmra.mxu1 %v268_v48 }
  0x92   :  { %v177_v50 = vpop.f32.mrf.mxu0 }
  0x93   :  { %v178_v51 = vadd.f32 %v702_v39, %v177_v50 }
  0x95   :  { %v269_v52 = vmax.f32 %v178_v51, 0.0 }
  0x97   :  { %339 = vmatmul.f32.gmra.mxu1 %v269_v52 }
  0x9a   :  { %v180_v54 = vpop.f32.mrf.mxu0 }
  0x9b   :  { %v181_v55 = vadd.f32 %v702_v39, %v180_v54 }
  0x9d   :  { %v270_v56 = vmax.f32 %v181_v55, 0.0 }
  0x9f   :  { %342 = vmatmul.f32.gmra.mxu1 %v270_v56  ;;  %v225_v24 = vpop.f32.mrf.mxu3 }
  0xa0   :  { %v226_v53 = vadd.f32 %v702_v39, %v225_v24 }
  0xa2   :  { %v183_v58 = vpop.f32.mrf.mxu0  ;;  %v285_v56 = vmax.f32 %v226_v53, 0.0 }
  0xa3   :  { %v184_v59 = vadd.f32 %v702_v39, %v183_v58 }
  0xa5   :  { %v271_v60 = vmax.f32 %v184_v59, 0.0 }
  0xa7   :  { %345 = vmatmul.f32.gmra.mxu1 %v271_v60  ;;  %v228_v28 = vpop.f32.mrf.mxu3 }
  0xa8   :  { %v229_v58 = vadd.f32 %v702_v39, %v228_v28 }
  0xaa   :  { %v186_v62 = vpop.f32.mrf.mxu0  ;;  %v286_v61 = vmax.f32 %v229_v58, 0.0 }
  0xab   :  { %v187_v63 = vadd.f32 %v702_v39, %v186_v62 }
  0xad   :  { %v272_v0 = vmax.f32 %v187_v63, 0.0 }
  0xaf   :  { %348 = vmatmul.f32.gmra.mxu1 %v272_v0  ;;  %v231_v32 = vpop.f32.mrf.mxu3 }
  0xb0   :  { %v232_v63 = vadd.f32 %v702_v39, %v231_v32 }
  0xb2   :  { %v189_v2 = vpop.f32.mrf.mxu0 }
  0xb3   :  { %v190_v3 = vadd.f32 %v702_v39, %v189_v2  ;;  %v287_v2 = vmax.f32 %v232_v63, 0.0 }
  0xb5   :  { %v273_v4 = vmax.f32 %v190_v3, 0.0 }
  0xb7   :  { %351 = vmatmul.f32.gmra.mxu1 %v273_v4  ;;  %v234_v36 = vpop.f32.mrf.mxu3 }
  0xb8   :  { %v235_v4 = vadd.f32 %v702_v39, %v234_v36 }
  0xba   :  { %v192_v6 = vpop.f32.mrf.mxu0 }
  0xbb   :  { %v193_v7 = vadd.f32 %v702_v39, %v192_v6 }
  0xbd   :  { %v274_v8 = vmax.f32 %v193_v7, 0.0  ;;  %v288_v7 = vmax.f32 %v235_v4, 0.0 }
  0xbf   :  { %354 = vmatmul.f32.gmra.mxu1 %v274_v8  ;;  %v237_v42 = vpop.f32.mrf.mxu3 }
  0xc0   :  { %v238_v9 = vadd.f32 %v702_v39, %v237_v42 }
  0xc2   :  { %v195_v10 = vpop.f32.mrf.mxu0 }
  0xc3   :  { %v196_v11 = vadd.f32 %v702_v39, %v195_v10 }
  0xc5   :  { %v275_v12 = vmax.f32 %v196_v11, 0.0 }
  0xc7   :  { %357 = vmatmul.f32.gmra.mxu1 %v275_v12  ;;  %v240_v48 = vpop.f32.mrf.mxu3  ;;  %v289_v12 = vmax.f32 %v238_v9, 0.0 }
  0xca   :  { %v198_v14 = vpop.f32.mrf.mxu0 }
  0xcb   :  { %v199_v15 = vadd.f32 %v702_v39, %v198_v14  ;;  %v241_v14 = vadd.f32 %v702_v39, %v240_v48 }
  0xcd   :  { %v276_v16 = vmax.f32 %v199_v15, 0.0 }
  0xcf   :  { %360 = vmatmul.f32.gmra.mxu1 %v276_v16  ;;  %v243_v54 = vpop.f32.mrf.mxu3 }
  0xd2   :  { %v201_v17 = vpop.f32.mrf.mxu0 }
  0xd3   :  { %v202_v18 = vadd.f32 %v702_v39, %v201_v17  ;;  %v290_v17 = vmax.f32 %v241_v14, 0.0 }
  0xd5   :  { %v277_v19 = vmax.f32 %v202_v18, 0.0 }
  0xd7   :  { %363 = vmatmul.f32.gmra.mxu1 %v277_v19  ;;  %v246_v59 = vpop.f32.mrf.mxu3  ;;  %v244_v19 = vadd.f32 %v702_v39, %v243_v54 }
  0xda   :  { %v204_v20 = vpop.f32.mrf.mxu0 }
  0xdb   :  { %v205_v21 = vadd.f32 %v702_v39, %v204_v20 }
  0xdd   :  { %v278_v22 = vmax.f32 %v205_v21, 0.0 }
  0xdf   :  { %366 = vmatmul.f32.gmra.mxu1 %v278_v22  ;;  %v249_v0 = vpop.f32.mrf.mxu3 }
  0xe2   :  { %v207_v23 = vpop.f32.mrf.mxu0 }
  0xe3   :  { %v208_v25 = vadd.f32 %v702_v39, %v207_v23  ;;  %v291_v23 = vmax.f32 %v244_v19, 0.0 }
  0xe5   :  { %v279_v26 = vmax.f32 %v208_v25, 0.0 }
  0xe7   :  { %369 = vmatmul.f32.gmra.mxu1 %v279_v26  ;;  %v252_v5 = vpop.f32.mrf.mxu3  ;;  %v247_v26 = vadd.f32 %v702_v39, %v246_v59 }
  0xea   :  { %v210_v27 = vpop.f32.mrf.mxu0 }
  0xeb   :  { %v211_v29 = vadd.f32 %v702_v39, %v210_v27 }
  0xed   :  { %v280_v30 = vmax.f32 %v211_v29, 0.0 }
  0xef   :  { %372 = vmatmul.f32.gmra.mxu1 %v280_v30  ;;  %v255_v10 = vpop.f32.mrf.mxu3  ;;  %v292_v30 = vmax.f32 %v247_v26, 0.0 }
  0xf2   :  { %v213_v31 = vpop.f32.mrf.mxu0 }
  0xf3   :  { %v214_v33 = vadd.f32 %v702_v39, %v213_v31 }
  0xf5   :  { %v281_v34 = vmax.f32 %v214_v33, 0.0  ;;  %v250_v33 = vadd.f32 %v702_v39, %v249_v0 }
  0xf7   :  { %375 = vmatmul.f32.gmra.mxu1 %v281_v34  ;;  %v258_v15 = vpop.f32.mrf.mxu3 }
  0xfa   :  { %v216_v35 = vpop.f32.mrf.mxu0 }
  0xfb   :  { %v217_v37 = vadd.f32 %v702_v39, %v216_v35  ;;  %v293_v35 = vmax.f32 %v250_v33, 0.0 }
  0xfd   :  { %v282_v38 = vmax.f32 %v217_v37, 0.0  ;;  %v253_v37 = vadd.f32 %v702_v39, %v252_v5 }
  0xff   :  { %378 = vmatmul.f32.vlgmr.msra.gmra.mxu2 %v282_v38  ;;  %v261_v20 = vpop.f32.mrf.mxu3 }
 0x100   :  { %v262_v21 = vadd.f32 %v702_v39, %v261_v20 }
 0x102   :  { %v219_v41 = vpop.f32.mrf.mxu0  ;;  %v297_v25 = vmax.f32 %v262_v21, 0.0 }
 0x103   :  { %v220_v43 = vadd.f32 %v702_v39, %v219_v41  ;;  %v294_v41 = vmax.f32 %v253_v37, 0.0 }
 0x104   :  { %v334_v44 = vpop.f32.mrf.mxu1  ;;  %423 = vmatmul.f32.vlgmr.msrb.gmra.mxu3 %v297_v25 }
 0x105   :  { %v283_v45 = vmax.f32 %v220_v43, 0.0  ;;  %v335_v46 = vadd.f32 %v767_v40, %v334_v44  ;;  %v256_v43 = vadd.f32 %v702_v39, %v255_v10 }
 0x107   :  { %431 = vst.msk [vmem:[%s949_s4] sm:$0xff] %vm430_vm2, %v335_v46  ;;  %381 = vmatmul.f32.gmra.mxu2 %v283_v45  ;;  %v264_v27 = vpop.f32.mrf.mxu3  ;;  %v295_v45 = vmax.f32 %v256_v43, 0.0 }
 0x108   :  { %v265_v28 = vadd.f32 %v702_v39, %v264_v27 }
 0x10a   :  { %v222_v47 = vpop.f32.mrf.mxu0  ;;  %v298_v32 = vmax.f32 %v265_v28, 0.0 }
 0x10b   :  { %v223_v49 = vadd.f32 %v702_v39, %v222_v47  ;;  %v259_v47 = vadd.f32 %v702_v39, %v258_v15 }
 0x10c   :  { %v337_v50 = vpop.f32.mrf.mxu1  ;;  %426 = vmatmul.f32.gmra.mxu3 %v298_v32 }
 0x10d   :  { %v284_v51 = vmax.f32 %v223_v49, 0.0  ;;  %v338_v52 = vadd.f32 %v767_v40, %v337_v50  ;;  %v296_v49 = vmax.f32 %v259_v47, 0.0 }
 0x10f   :  { %432 = vst.msk [vmem:[%s949_s4 + $0x8] sm:$0xff] %vm430_vm2, %v338_v52  ;;  %384 = vmatmul.f32.gmra.mxu2 %v284_v51 }
 0x114   :  { %v340_v55 = vpop.f32.mrf.mxu1 }
 0x115   :  { %v341_v57 = vadd.f32 %v767_v40, %v340_v55 }
 0x117   :  { %433 = vst.msk [vmem:[%s949_s4 + $0x10] sm:$0xff] %vm430_vm2, %v341_v57  ;;  %387 = vmatmul.f32.gmra.mxu2 %v285_v56 }
 0x11c   :  { %v343_v60 = vpop.f32.mrf.mxu1 }
 0x11d   :  { %v344_v62 = vadd.f32 %v767_v40, %v343_v60 }
 0x11f   :  { %434 = vst.msk [vmem:[%s949_s4 + $0x18] sm:$0xff] %vm430_vm2, %v344_v62  ;;  %390 = vmatmul.f32.gmra.mxu2 %v286_v61 }
 0x124   :  { %v346_v1 = vpop.f32.mrf.mxu1 }
 0x125   :  { %v347_v3 = vadd.f32 %v767_v40, %v346_v1 }
 0x127   :  { %435 = vst.msk [vmem:[%s949_s4 + $0x20] sm:$0xff] %vm430_vm2, %v347_v3  ;;  %393 = vmatmul.f32.gmra.mxu2 %v287_v2 }
 0x12c   :  { %v349_v6 = vpop.f32.mrf.mxu1 }
 0x12d   :  { %v350_v8 = vadd.f32 %v767_v40, %v349_v6 }
 0x12f   :  { %436 = vst.msk [vmem:[%s949_s4 + $0x28] sm:$0xff] %vm430_vm2, %v350_v8  ;;  %396 = vmatmul.f32.gmra.mxu2 %v288_v7 }
 0x134   :  { %v352_v11 = vpop.f32.mrf.mxu1 }
 0x135   :  { %v353_v13 = vadd.f32 %v767_v40, %v352_v11 }
 0x137   :  { %437 = vst.msk [vmem:[%s949_s4 + $0x30] sm:$0xff] %vm430_vm2, %v353_v13  ;;  %399 = vmatmul.f32.gmra.mxu2 %v289_v12 }
 0x13c   :  { %v355_v16 = vpop.f32.mrf.mxu1 }
 0x13d   :  { %v356_v18 = vadd.f32 %v767_v40, %v355_v16 }
 0x13f   :  { %438 = vst.msk [vmem:[%s949_s4 + $0x38] sm:$0xff] %vm430_vm2, %v356_v18  ;;  %402 = vmatmul.f32.gmra.mxu2 %v290_v17 }
 0x144   :  { %v358_v22 = vpop.f32.mrf.mxu1 }
 0x145   :  { %v359_v24 = vadd.f32 %v767_v40, %v358_v22 }
 0x147   :  { %439 = vst.msk [vmem:[%s949_s4 + $0x40] sm:$0xff] %vm430_vm2, %v359_v24  ;;  %405 = vmatmul.f32.gmra.mxu2 %v291_v23 }
 0x14c   :  { %v361_v29 = vpop.f32.mrf.mxu1 }
 0x14d   :  { %v362_v31 = vadd.f32 %v767_v40, %v361_v29 }
 0x14f   :  { %440 = vst.msk [vmem:[%s949_s4 + $0x48] sm:$0xff] %vm430_vm2, %v362_v31  ;;  %408 = vmatmul.f32.gmra.mxu2 %v292_v30 }
 0x154   :  { %v364_v34 = vpop.f32.mrf.mxu1 }
 0x155   :  { %v365_v36 = vadd.f32 %v767_v40, %v364_v34 }
 0x157   :  { %441 = vst.msk [vmem:[%s949_s4 + $0x50] sm:$0xff] %vm430_vm2, %v365_v36  ;;  %411 = vmatmul.f32.gmra.mxu2 %v293_v35 }
 0x15c   :  { %v367_v38 = vpop.f32.mrf.mxu1 }
 0x15d   :  { %v368_v42 = vadd.f32 %v767_v40, %v367_v38 }
 0x15f   :  { %442 = vst.msk [vmem:[%s949_s4 + $0x58] sm:$0xff] %vm430_vm2, %v368_v42  ;;  %414 = vmatmul.f32.gmra.mxu2 %v294_v41 }
 0x164   :  { %v370_v44 = vpop.f32.mrf.mxu1 }
 0x165   :  { %v371_v46 = vadd.f32 %v767_v40, %v370_v44 }
 0x167   :  { %443 = vst.msk [vmem:[%s949_s4 + $0x60] sm:$0xff] %vm430_vm2, %v371_v46  ;;  %417 = vmatmul.f32.gmra.mxu2 %v295_v45 }
 0x16c   :  { %v373_v48 = vpop.f32.mrf.mxu1 }
 0x16d   :  { %v374_v50 = vadd.f32 %v767_v40, %v373_v48 }
 0x16f   :  { %444 = vst.msk [vmem:[%s949_s4 + $0x68] sm:$0xff] %vm430_vm2, %v374_v50  ;;  %420 = vmatmul.f32.gmra.mxu2 %v296_v49 }
 0x174   :  { %v376_v51 = vpop.f32.mrf.mxu1 }
 0x175   :  { %v377_v52 = vadd.f32 %v767_v40, %v376_v51 }
 0x177   :  { %445 = vst.msk [vmem:[%s949_s4 + $0x70] sm:$0xff] %vm430_vm2, %v377_v52 }
 0x182   :  { %v379_v53 = vpop.f32.mrf.mxu2 }
 0x183   :  { %v380_v39 = vadd.f32 %v767_v40, %v379_v53 }
 0x185   :  { %446 = vst.msk [vmem:[%s949_s4 + $0x78] sm:$0xff] %vm430_vm2, %v380_v39 }
 0x187   :  { %v424_v7 = vpop.f32.mrf.mxu3 }
 0x188   :  { %v425_v9 = vadd.f32 %v767_v40, %v424_v7 }
 0x18a   :  { %v382_v54 = vpop.f32.mrf.mxu2  ;;  %461 = vst.msk [vmem:[%s949_s4 + $0xf0] sm:$0xff] %vm430_vm2, %v425_v9 }
 0x18b   :  { %v383_v55 = vadd.f32 %v767_v40, %v382_v54 }
 0x18d   :  { %447 = vst.msk [vmem:[%s949_s4 + $0x80] sm:$0xff] %vm430_vm2, %v383_v55 }
 0x18f   :  { %v427_v11 = vpop.f32.mrf.mxu3 }
 0x190   :  { %v428_v13 = vadd.f32 %v767_v40, %v427_v11 }
 0x192   :  { %v385_v56 = vpop.f32.mrf.mxu2  ;;  %462 = vst.msk [vmem:[%s949_s4 + $0xf8] sm:$0xff] %vm430_vm2, %v428_v13 }
 0x193   :  { %v386_v57 = vadd.f32 %v767_v40, %v385_v56 }
 0x195   :  { %448 = vst.msk [vmem:[%s949_s4 + $0x88] sm:$0xff] %vm430_vm2, %v386_v57 }
 0x19a   :  { %v388_v58 = vpop.f32.mrf.mxu2 }
 0x19b   :  { %v389_v59 = vadd.f32 %v767_v40, %v388_v58 }
 0x19d   :  { %449 = vst.msk [vmem:[%s949_s4 + $0x90] sm:$0xff] %vm430_vm2, %v389_v59 }
 0x1a2   :  { %v391_v60 = vpop.f32.mrf.mxu2 }
 0x1a3   :  { %v392_v61 = vadd.f32 %v767_v40, %v391_v60 }
 0x1a5   :  { %450 = vst.msk [vmem:[%s949_s4 + $0x98] sm:$0xff] %vm430_vm2, %v392_v61 }
 0x1aa   :  { %v394_v62 = vpop.f32.mrf.mxu2 }
 0x1ab   :  { %v395_v63 = vadd.f32 %v767_v40, %v394_v62 }
 0x1ad   :  { %451 = vst.msk [vmem:[%s949_s4 + $0xa0] sm:$0xff] %vm430_vm2, %v395_v63 }
 0x1b2   :  { %v397_v0 = vpop.f32.mrf.mxu2 }
 0x1b3   :  { %v398_v1 = vadd.f32 %v767_v40, %v397_v0 }
 0x1b5   :  { %452 = vst.msk [vmem:[%s949_s4 + $0xa8] sm:$0xff] %vm430_vm2, %v398_v1 }
 0x1ba   :  { %v400_v2 = vpop.f32.mrf.mxu2 }
 0x1bb   :  { %v401_v3 = vadd.f32 %v767_v40, %v400_v2 }
 0x1bd   :  { %453 = vst.msk [vmem:[%s949_s4 + $0xb0] sm:$0xff] %vm430_vm2, %v401_v3 }
 0x1c2   :  { %v403_v4 = vpop.f32.mrf.mxu2 }
 0x1c3   :  { %v404_v5 = vadd.f32 %v767_v40, %v403_v4 }
 0x1c5   :  { %454 = vst.msk [vmem:[%s949_s4 + $0xb8] sm:$0xff] %vm430_vm2, %v404_v5 }
 0x1ca   :  { %v406_v6 = vpop.f32.mrf.mxu2 }
 0x1cb   :  { %v407_v8 = vadd.f32 %v767_v40, %v406_v6 }
 0x1cd   :  { %455 = vst.msk [vmem:[%s949_s4 + $0xc0] sm:$0xff] %vm430_vm2, %v407_v8 }
 0x1d2   :  { %v409_v10 = vpop.f32.mrf.mxu2 }
 0x1d3   :  { %v410_v12 = vadd.f32 %v767_v40, %v409_v10 }
 0x1d5   :  { %456 = vst.msk [vmem:[%s949_s4 + $0xc8] sm:$0xff] %vm430_vm2, %v410_v12 }
 0x1da   :  { %v412_v14 = vpop.f32.mrf.mxu2 }
 0x1db   :  { %v413_v15 = vadd.f32 %v767_v40, %v412_v14 }
 0x1dd   :  { %457 = vst.msk [vmem:[%s949_s4 + $0xd0] sm:$0xff] %vm430_vm2, %v413_v15 }
 0x1e2   :  { %v415_v16 = vpop.f32.mrf.mxu2 }
 0x1e3   :  { %v416_v17 = vadd.f32 %v767_v40, %v415_v16 }
 0x1e5   :  { %458 = vst.msk [vmem:[%s949_s4 + $0xd8] sm:$0xff] %vm430_vm2, %v416_v17 }
 0x1ea   :  { %v418_v18 = vpop.f32.mrf.mxu2 }
 0x1eb   :  { %v419_v19 = vadd.f32 %v767_v40, %v418_v18 }
 0x1ed   :  { %459 = vst.msk [vmem:[%s949_s4 + $0xe0] sm:$0xff] %vm430_vm2, %v419_v19 }
 0x1f2   :  { %v421_v20 = vpop.f32.mrf.mxu2 }
 0x1f3   :  { %v422_v21 = vadd.f32 %v767_v40, %v421_v20 }
 0x1f5   :  { %460 = vst.msk [vmem:[%s949_s4 + $0xe8] sm:$0xff] %vm430_vm2, %v422_v21 }

</bundles_post_ra>
